<compile_context>
chip_gen: v7x
topology: tpu7x:2x2x1
jax: 0.10.0
libtpu: 0.0.40
codegen_flags: <defaults>
</compile_context>

<pallas_src>
import functools

import jax
import jax.numpy as jnp
from jax.experimental import pallas as pl
from jax.experimental.pallas import tpu as pltpu

MEAN = [0.48145466, 0.4578275, 0.40821073]
STD = [0.26862954, 0.26130258, 0.27577711]

# Conservative explicit scoped-VMEM limit: fits v7x (64 MiB physical per TC)
# and comfortably inside v5e/v6e (128 MiB physical).
_VMEM_LIMIT_BYTES = 48 * 1024 * 1024
_TARGET_BLOCK_BYTES = 4 * 1024 * 1024  # per-buffer block budget (~4 MiB)


def _normalize_kernel(x_ref, scale_ref, bias_ref, o_ref):
    # x_ref: (br, bc); scale_ref/bias_ref: (br, 1) broadcast across lanes.
    # Single fused multiply-add, single store stream per vreg.
    o_ref[...] = (x_ref[...] * scale_ref[...] + bias_ref[...]).astype(o_ref.dtype)


def _sublane_multiple(itemsize):
    # Native packed-vreg sublane tile: 8 (f32), 16 (bf16), 32 (int8/fp8).
    return max(8, 32 // itemsize)


def _choose_tiles(rows, cols, in_itemsize, out_itemsize,
                  target_bytes=_TARGET_BLOCK_BYTES):
    """Pick (block_rows, block_cols) obeying the (sublane, 128) rule with a
    ~target_bytes per-buffer budget, dtype-aware sublane rounding, and an even
    row-step count when multi-step (v7x megacore load balance)."""
    itemsize = max(in_itemsize, out_itemsize)
    sub = max(_sublane_multiple(in_itemsize), _sublane_multiple(out_itemsize))

    # Lane (column) tile: full width, capped so that even a minimum-height
    # (sub-row) block stays within the budget (fixes the old 8-MiB overshoot).
    if cols % 128 == 0:
        max_cols = max(128, target_bytes // (sub * itemsize))
        bc = min(cols, (max_cols // 128) * 128)
    else:
        bc = cols  # must equal the full dim when not 128-divisible

    # Sublane (row) tile: multiple of `sub`, or the full dim if rows <= sub.
    if rows <= sub:
        br = rows
    else:
        rows_budget = max(sub, target_bytes // (bc * itemsize))
        br = min(rows, (rows_budget // sub) * sub)
        if br < rows:
            # Megacore load balance: prefer an even number of row steps so the
            # two v7x TensorCores split the parallel axis evenly.  Shrink br by
            # at most a few sublane steps; never below one sublane tile.
            steps = pl.cdiv(rows, br)
            if steps > 1 and steps % 2 == 1:
                cand = br - sub
                floor = max(sub, br - 4 * sub)
                while cand >= floor:
                    if pl.cdiv(rows, cand) % 2 == 0:
                        br = cand
                        break
                    cand -= sub
    return br, bc


@functools.partial(jax.jit, static_argnames=("out_dtype",))
def normalize(x, mean, std, out_dtype=None):
    """x: (N, C, H, W); mean/std: (C,).  Returns (x - mean[c]) / std[c]."""
    N, C, H, W = x.shape
    R, L = N * C, H * W
    out_dtype = x.dtype if out_dtype is None else jnp.dtype(out_dtype)

    # Lane-dense 2-D view: rows = (n, c) pairs, lanes = the spatial plane.
    x2 = x.reshape(R, L)

    # Fold (mean, std) into per-row scale/bias (exact f32 reciprocal of std).
    # NOTE: x*scale + bias is ~1-2 ulp from torchvision's (x-mean)/std; fine at
    # the tolerances used here.
    scale = (1.0 / std).astype(x.dtype)            # (C,)
    bias = (-mean * scale).astype(x.dtype)         # (C,)
    scale_rows = jnp.tile(scale, N).reshape(R, 1)  # row r -> channel r % C
    bias_rows = jnp.tile(bias, N).reshape(R, 1)

    br, bc = _choose_tiles(R, L, x.dtype.itemsize, out_dtype.itemsize)
    grid = (pl.cdiv(R, br), pl.cdiv(L, bc))

    out2 = pl.pallas_call(
        _normalize_kernel,
        out_shape=jax.ShapeDtypeStruct((R, L), out_dtype),
        grid=grid,
        in_specs=[
            pl.BlockSpec((br, bc), lambda i, j: (i, j)),   # x
            pl.BlockSpec((br, 1), lambda i, j: (i, 0)),    # scale (per row)
            pl.BlockSpec((br, 1), lambda i, j: (i, 0)),    # bias  (per row)
        ],
        out_specs=pl.BlockSpec((br, bc), lambda i, j: (i, j)),
        compiler_params=pltpu.CompilerParams(
            dimension_semantics=("parallel", "parallel"),
            vmem_limit_bytes=_VMEM_LIMIT_BYTES,
        ),
    )(x2, scale_rows, bias_rows)

    return out2.reshape(N, C, H, W)


def _reference(x, mean, std):
    C = mean.shape[0]
    return (x - mean.reshape(C, 1, 1)) / std.reshape(C, 1, 1)


if __name__ == "__main__":
    key = jax.random.PRNGKey(0)
    mean = jnp.asarray(MEAN, dtype=jnp.float32)  # (C,)
    std = jnp.asarray(STD, dtype=jnp.float32)    # (C,)

    # Small NCHW input consistent with the 3-channel mean/std of the module.
    N, C, H, W = 2, 3, 16, 16
    k1, k2 = jax.random.split(key)
    x = jax.random.uniform(k1, (N, C, H, W), dtype=jnp.float32)

    out = jax.block_until_ready(normalize(x, mean, std))
    ref = _reference(x, mean, std)
    assert out.shape == x.shape and out.dtype == x.dtype
    assert jnp.allclose(out, ref, atol=1e-5, rtol=1e-5)

    # Non-128-multiple lane path (H*W = 400).
    x2 = jax.random.uniform(k2, (2, 3, 20, 20), dtype=jnp.float32)
    out2 = jax.block_until_ready(normalize(x2, mean, std))
    ref2 = _reference(x2, mean, std)
    assert jnp.allclose(out2, ref2, atol=1e-5, rtol=1e-5)

    # Optional bf16-output path (halves store-side HBM traffic for bf16 consumers).
    out_bf16 = jax.block_until_ready(normalize(x, mean, std, out_dtype=jnp.bfloat16))
    assert out_bf16.dtype == jnp.bfloat16
    assert jnp.allclose(out_bf16.astype(jnp.float32), ref, atol=2e-2, rtol=2e-2)

    print("KERNEL_OK")
</pallas_src>

<mosaic_0001>
module attributes {stable_mosaic.version = 11 : i64} {
  func.func @_normalize_kernel(%arg0: i32, %arg1: i32, %arg2: memref<6x256xf32, #tpu.memory_space<vmem>>, %arg3: memref<6x1xf32, #tpu.memory_space<vmem>>, %arg4: memref<6x1xf32, #tpu.memory_space<vmem>>, %arg5: memref<6x256xf32, #tpu.memory_space<vmem>>) attributes {dimension_semantics = [#tpu.dimension_semantics<parallel>, #tpu.dimension_semantics<parallel>], iteration_bounds = array<i64: 1, 1>, scalar_prefetch = 0 : i64, scratch_operands = 0 : i64, tpu.core_type = #tpu.core_type<tc>, window_params = [{transform_indices = @transform_0, window_bounds = array<i64: 6, 256>}, {transform_indices = @transform_1, window_bounds = array<i64: 6, 1>}, {transform_indices = @transform_2, window_bounds = array<i64: 6, 1>}, {transform_indices = @transform_3, window_bounds = array<i64: 6, 256>}]} {
    %c0 = arith.constant 0 : index
    %c0_0 = arith.constant 0 : index
    %0 = vector.load %arg2[%c0, %c0_0] : memref<6x256xf32, #tpu.memory_space<vmem>>, vector<6x256xf32>
    %c0_1 = arith.constant 0 : index
    %c0_2 = arith.constant 0 : index
    %1 = vector.load %arg3[%c0_1, %c0_2] : memref<6x1xf32, #tpu.memory_space<vmem>>, vector<6x1xf32>
    %2 = vector.broadcast %1 : vector<6x1xf32> to vector<6x256xf32>
    %3 = arith.mulf %0, %2 : vector<6x256xf32>
    %c0_3 = arith.constant 0 : index
    %c0_4 = arith.constant 0 : index
    %4 = vector.load %arg4[%c0_3, %c0_4] : memref<6x1xf32, #tpu.memory_space<vmem>>, vector<6x1xf32>
    %5 = vector.broadcast %4 : vector<6x1xf32> to vector<6x256xf32>
    %6 = arith.addf %3, %5 : vector<6x256xf32>
    %c0_5 = arith.constant 0 : index
    %c0_6 = arith.constant 0 : index
    %7 = vector.load %arg5[%c0_5, %c0_6] : memref<6x256xf32, #tpu.memory_space<vmem>>, vector<6x256xf32>
    tpu.vector_store %arg5[%c0_5, %c0_6], %6 {strides = array<i32>} : memref<6x256xf32, #tpu.memory_space<vmem>>, vector<6x256xf32>,
    return
  }
  func.func @transform_0(%arg0: i32, %arg1: i32) -> (i32, i32) {
    %c0_i32 = arith.constant 0 : i32
    return %arg0, %arg1 : i32, i32
  }
  func.func @transform_1(%arg0: i32, %arg1: i32) -> (i32, i32) {
    %c0_i32 = arith.constant 0 : i32
    %c0_i32_0 = arith.constant 0 : i32
    return %arg0, %c0_i32 : i32, i32
  }
  func.func @transform_2(%arg0: i32, %arg1: i32) -> (i32, i32) {
    %c0_i32 = arith.constant 0 : i32
    %c0_i32_0 = arith.constant 0 : i32
    return %arg0, %c0_i32 : i32, i32
  }
  func.func @transform_3(%arg0: i32, %arg1: i32) -> (i32, i32) {
    %c0_i32 = arith.constant 0 : i32
    return %arg0, %arg1 : i32, i32
  }
}

</mosaic_0001>

<bundles_post_ra>
// kernel: tile.0
= control target key start
LH: loop header
LB: loop body
LE: loop exit
PB: predicated region body
PF: predicated region fallthrough
CT: control target
= control target key end

     0   :  { %vm7_vm0 = vcmask 7168   ;;  %s26_s10 = smov 126   ;;  %s49_s0 = inlined_call_operand.vmem [shape: f32[2,3], index: 0, kind: input, shape index: {}]   ;;  %s50_s1 = inlined_call_operand.vmem [shape: f32[6,1], index: 1, kind: output, shape index: {}]  }
   0x1   :  { %v4_v0 = vld [vmem:[%s49_s0] sm:$0x3]  ;;  %s25_s0 = smov 127  }
   0x2   :  { %5 = vst [vmem:[#allocation0] sm:$0x3] %v4_v0 }
   0x9   :  { %v9_v1 = vld [vmem:[#allocation0] sm:$0x3]  }
   0xa   :  { %v6_v2 = vld [vmem:[#allocation0] sm:$0x3]   ;;  %10 = vrot.lane.b32.xlu0 %v9_v1, %s25_s0 }
   0xb   :  { %8 = vst.msk [vmem:[%s50_s1] ss:$3 sm:$0x3] %vm7_vm0, %v6_v2   ;;  %v15_v3 = vld [vmem:[#allocation0] sm:$0x3]  }
   0xe   :  { %16 = vrot.lane.b32.xlu0 %v15_v3, %s26_s10 }
  0x7c   :  { %v11_v4 = vpop.permute.xlu0 %10  }
  0x7d   :  { %21 = vst.msk [vmem:[%s50_s1 + $0x1] ss:$3 sm:$0x3] %vm7_vm0, %v11_v4  }
  0x80   :  { %v17_v5 = vpop.permute.xlu0 %16  }
  0x81   :  { %22 = vst.msk [vmem:[%s50_s1 + $0x2] ss:$3 sm:$0x3] %vm7_vm0, %v17_v5  }

// kernel: tile.18
= control target key start
LH: loop header
LB: loop body
LE: loop exit
PB: predicated region body
PF: predicated region fallthrough
CT: control target
= control target key end

     0   :  { %s22_s0 = inlined_call_operand.vmem [shape: f32[3], index: 0, kind: input, shape index: {}]   ;;  %s23_s1 = inlined_call_operand.vmem [shape: f32[2,3], index: 1, kind: output, shape index: {}]  }
   0x1   :  { %v4_v0 = vld [vmem:[%s22_s0] ss:$0 sm:$0xff] }
   0x2   :  { %5 = vst [vmem:[%s23_s1] sm:$0x3] %v4_v0 }

// kernel: normalize.1
= control target key start
LH: loop header
LB: loop body
LE: loop exit
PB: predicated region body
PF: predicated region fallthrough
CT: control target
= control target key end

     0   :  { %v40_v0 = vmov 0   ;;  %s79_s1 = inlined_call_operand.vmem [shape: f32[6,1], index: 1, kind: input, shape index: {}]   ;;  %s80_s2 = inlined_call_operand.vmem [shape: f32[6,1], index: 2, kind: input, shape index: {}]   ;;  %s81_s0 = inlined_call_operand.vmem [shape: f32[6,256], index: 0, kind: input, shape index: {}]   ;;  %s82_s3 = inlined_call_operand.vmem [shape: f32[6,256], index: 3, kind: output, shape index: {}]  }
   0x1   :  { %39 = vset.pattern.permute.xlu0 %v40_v0  ;;  %v16_v1 = vld [vmem:[%s79_s1] sm:$0x3f]  ;;  %v15_v5 = vld [vmem:[%s81_s0 + $0x8] sm:$0x3f] }
   0x2   :  { %19 = vperm.xlu0 %39, %v16_v1   ;;  %v24_v2 = vld [vmem:[%s80_s2] sm:$0x3f] }
   0x3   :  { %v14_v4 = vld [vmem:[%s81_s0] sm:$0x3f] }
   0x6   :  { %27 = vperm.xlu0 %39, %v24_v2  }
  0x81   :  { %v20_v3 = vpop.permute.xlu0 %19 }
  0x82   :  { %v22_v6 = vmul.f32 %v20_v3, %v14_v4  ;;  %v23_v7 = vmul.f32 %v20_v3, %v15_v5 }
  0x85   :  { %v28_v8 = vpop.permute.xlu0 %27 }
  0x86   :  { %v30_v9 = vadd.f32 %v28_v8, %v22_v6  ;;  %v31_v10 = vadd.f32 %v28_v8, %v23_v7 }
  0x88   :  { %32 = vst [vmem:[%s82_s3] sm:$0x3f] %v30_v9  ;;  %33 = vst [vmem:[%s82_s3 + $0x8] sm:$0x3f] %v31_v10 }

</bundles_post_ra>
